<compile_context>
chip_gen: v7x
topology: tpu7x:2x2x1
jax: 0.10.0
libtpu: 0.0.40
codegen_flags: <defaults>
</compile_context>

<pallas_src>
import jax
import jax.numpy as jnp
from jax import lax
from jax.experimental import pallas as pl
from jax.experimental.pallas import tpu as pltpu

_LANE = 128
# lhs (M, K) x rhs (N, K) -> (M, N): same TRANS_B dimension numbers used by the
# reference flash-attention TPU kernel.
_TRANS_B_DIMS = (((1,), (1,)), ((), ()))


def _round_up(x, m):
    return ((x + m - 1) // m) * m


def _make_mlp_critic_kernel(tanh_dtype):
    def kernel(x_ref, w1_ref, b1_ref, w2_ref, b2_ref, w3_ref, b3_ref, o_ref):
        # Layer 1: Linear on the MXU (f32 accumulation) + Tanh (EUP).
        z1 = (jnp.dot(x_ref[...], w1_ref[...], preferred_element_type=jnp.float32)
              + b1_ref[...])
        h = jnp.tanh(z1.astype(tanh_dtype))
        # Layer 2: Linear + Tanh (activations cast to the weight dtype for the MXU).
        z2 = (jnp.dot(h.astype(w2_ref.dtype), w2_ref[...],
                      preferred_element_type=jnp.float32)
              + b2_ref[...])
        h = jnp.tanh(z2.astype(tanh_dtype))
        # Output layer Linear(h2 -> 1), lane-dense epilogue: w3 arrives replicated to
        # (8, h2); a TRANS_B matmul gives (8, tile_b) with the batch in the lane dim,
        # so the store to the (1, tile_b) output block is lane-dense.
        v = lax.dot_general(w3_ref[...], h.astype(w3_ref.dtype),
                            dimension_numbers=_TRANS_B_DIMS,
                            preferred_element_type=jnp.float32)   # (8, tile_b)
        o_ref[...] = v[0:1, :] + b3_ref[0]
    return kernel


def _choose_tile_b(B, num_obs, compute_bytes, max_tile=4096):
    """Largest batch tile whose double-buffered obs blocks fit a VMEM budget.

    Uses the lane-padded row size (the obs block's last dim pads to 128 lanes in
    VMEM).  Returns either B (single grid step, full-array blocks) or a multiple of
    128 (legal lane-dense (1, tile_b) output block and bf16 (16,128) sublane
    packing); non-divisible batches are zero-padded by the wrapper."""
    obs_budget_bytes = 16 * 2**20
    row_bytes = _round_up(max(num_obs, _LANE), _LANE) * compute_bytes
    cap = min(max_tile, obs_budget_bytes // (2 * row_bytes))
    cap -= cap % _LANE
    cap = max(cap, _LANE)
    if B <= cap:
        return B
    return cap


def _vmem_limit_bytes(tile_b, num_obs, d1, d2, compute_bytes):
    obs_bufs = 2 * tile_b * _round_up(max(num_obs, _LANE), _LANE) * compute_bytes
    out_bufs = 2 * 8 * max(tile_b, _LANE) * 4          # (1, tile_b) block pads to 8 sublanes
    weights = 2 * (
        _round_up(num_obs, 8) * _round_up(d1, _LANE) * compute_bytes
        + _round_up(d1, 8) * _round_up(d2, _LANE) * compute_bytes
        + 8 * _round_up(d2, _LANE) * compute_bytes       # replicated w3 (8, d2)
        + 8 * (_round_up(d1, _LANE) + _round_up(d2, _LANE)) * 4)   # biases
    est = obs_bufs + out_bufs + weights
    # Generation-aware ceiling: stay <=48 MiB under v7x's 64 MiB physical VMEM,
    # allow up to 96 MiB on v5e/v6e (128 MiB physical).
    try:
        phys = pltpu.get_tpu_info().vmem_capacity_bytes
    except Exception:
        phys = None
    cap = 96 * 2**20 if (phys is not None and phys > 100 * 2**20) else 48 * 2**20
    return int(min(max(2 * est, 16 * 2**20), cap))


def _bf16_transcendentals_ok():
    """True on v6e / v7x (bf16 EUP/VPU); False on v5e and older (tanh stays f32)."""
    try:
        kind = jax.devices()[0].device_kind.lower()
    except Exception:
        return False
    return not any(tag in kind for tag in ("v2", "v3", "v4", "v5"))


def mlp_critic_forward(obs, params, *, compute_dtype=jnp.bfloat16, tile_b=None):
    """Pallas MLPCritic forward. obs: (B, num_obs). Returns (B,) float32.

    compute_dtype is the MXU-input dtype for obs / W1 / W2 / W3.  bfloat16 is the
    default on every TPU generation (the v5e MXU is natively bf16 too); biases,
    accumulation (preferred_element_type=f32) and the output stay float32, and tanh
    runs in f32 except on v6e/v7x where it uses the bf16 EUP.  Pass
    compute_dtype=jnp.float32 for numerics matching the PyTorch module."""
    (w1, b1), (w2, b2), (w3, b3) = params
    B, num_obs = obs.shape
    d1 = w1.shape[1]
    d2 = w2.shape[1]

    compute_dtype = jnp.dtype(compute_dtype)
    compute_bytes = compute_dtype.itemsize
    if tile_b is None:
        tile_b = _choose_tile_b(B, num_obs, compute_bytes)
    assert tile_b >= B or tile_b % _LANE == 0, (
        "explicit tile_b must cover the whole batch or be a multiple of 128")

    # Pad the batch to a multiple of tile_b (zero rows; output sliced back) instead
    # of degrading to one huge full-array block for non-divisible batches.
    B_pad = _round_up(B, tile_b)
    grid = (B_pad // tile_b,)

    # Trace-time casts / reshapes of the parameters (free); casting obs also halves
    # its HBM->VMEM DMA bytes on the bf16 path (obs is the only streamed operand).
    obs_c = obs.astype(compute_dtype)
    if B_pad != B:
        obs_c = jnp.pad(obs_c, ((0, B_pad - B), (0, 0)))
    w1_c = w1.astype(compute_dtype)
    w2_c = w2.astype(compute_dtype)
    b1_r = b1.reshape(1, d1).astype(jnp.float32)
    b2_r = b2.reshape(1, d2).astype(jnp.float32)
    # w3 as a sublane-replicated (8, d2) row block -> lane-dense TRANS_B epilogue.
    w3_rep = jnp.tile(w3.reshape(1, d2), (8, 1)).astype(compute_dtype)
    b3_s = jnp.asarray(b3, jnp.float32).reshape(-1)[:1]     # (1,) scalar in SMEM

    tanh_dtype = (compute_dtype
                  if (compute_dtype == jnp.bfloat16 and _bf16_transcendentals_ok())
                  else jnp.float32)

    cost = pl.CostEstimate(
        flops=2 * B_pad * (num_obs * d1 + d1 * d2 + 8 * d2),
        transcendentals=B_pad * (d1 + d2),
        bytes_accessed=(B_pad * num_obs * compute_bytes
                        + (num_obs * d1 + d1 * d2 + 8 * d2) * compute_bytes
                        + (d1 + d2 + 1) * 4
                        + B_pad * 4),
    )

    out = pl.pallas_call(
        _make_mlp_critic_kernel(tanh_dtype),
        out_shape=jax.ShapeDtypeStruct((1, B_pad), jnp.float32),
        grid_spec=pltpu.PrefetchScalarGridSpec(
            num_scalar_prefetch=0,
            grid=grid,
            in_specs=[
                # obs tile: the only streamed operand, marched over the batch.
                pl.BlockSpec((tile_b, num_obs), lambda i: (i, 0)),
                # weights / biases: whole arrays, resident across the grid.
                pl.BlockSpec((num_obs, d1), lambda i: (0, 0)),
                pl.BlockSpec((1, d1), lambda i: (0, 0)),
                pl.BlockSpec((d1, d2), lambda i: (0, 0)),
                pl.BlockSpec((1, d2), lambda i: (0, 0)),
                pl.BlockSpec((8, d2), lambda i: (0, 0)),
                # b3 scalar in SMEM as a 1-D (1,) array (no 2-D SMEM padding).
                pl.BlockSpec(memory_space=pltpu.MemorySpace.SMEM),
            ],
            # Lane-dense output: (1, tile_b) blocks of a (1, B_pad) slab.
            out_specs=pl.BlockSpec((1, tile_b), lambda i: (0, i)),
        ),
        compiler_params=pltpu.CompilerParams(
            dimension_semantics=("parallel",),   # batch tiles shard across v7x's 2 TCs
            vmem_limit_bytes=_vmem_limit_bytes(tile_b, num_obs, d1, d2, compute_bytes),
        ),
        cost_estimate=cost,
    )(obs_c, w1_c, b1_r, w2_c, b2_r, w3_rep, b3_s)

    # .squeeze(-1) of the PyTorch forward (+ drop padded rows).
    return out[0, :B]


def init_linear(key, fan_in, fan_out):
    """PyTorch-style Linear init: U(-1/sqrt(fan_in), 1/sqrt(fan_in)).
    Weight returned as (fan_in, fan_out) (transposed vs. torch's (out, in))."""
    kw, kb = jax.random.split(key)
    bound = 1.0 / jnp.sqrt(jnp.float32(fan_in))
    w = jax.random.uniform(kw, (fan_in, fan_out), jnp.float32, -bound, bound)
    b = jax.random.uniform(kb, (1, fan_out), jnp.float32, -bound, bound)
    return w, b


def reference_forward(obs, params):
    (w1, b1), (w2, b2), (w3, b3) = params
    h = jnp.tanh(obs @ w1 + b1)
    h = jnp.tanh(h @ w2 + b2)
    return (h @ w3 + b3)[:, 0]


if __name__ == "__main__":
    # Small shapes consistent with MLPCritic(num_obs, hidden_sizes=(64, 64), Tanh)
    B = 16
    num_obs = 32
    hidden_sizes = (64, 64)

    key = jax.random.PRNGKey(0)
    k_obs, k1, k2, k3 = jax.random.split(key, 4)

    obs = jax.random.normal(k_obs, (B, num_obs), jnp.float32)
    params = (
        init_linear(k1, num_obs, hidden_sizes[0]),
        init_linear(k2, hidden_sizes[0], hidden_sizes[1]),
        init_linear(k3, hidden_sizes[1], 1),
    )

    v_ref = reference_forward(obs, params)

    # Exact path (f32 MXU inputs, f32 tanh) -- matches the PyTorch module's numerics.
    v_f32 = jax.block_until_ready(
        mlp_critic_forward(obs, params, compute_dtype=jnp.float32))
    assert v_f32.shape == (B,), f"bad output shape {v_f32.shape}"
    assert jnp.allclose(v_f32, v_ref, atol=1e-5, rtol=1e-5), "f32 mismatch vs. reference"

    # Default bf16 fast path (all generations); f32 accumulation + f32 biases/output.
    v_bf16 = jax.block_until_ready(mlp_critic_forward(obs, params))
    assert v_bf16.shape == (B,), f"bad output shape {v_bf16.shape}"
    assert jnp.allclose(v_bf16, v_ref, atol=1e-1, rtol=1e-2), \
        "bf16 mismatch vs. reference (reduced-precision path)"

    # Multi-step tiled + zero-padded path (non-divisible batch, lane-dense output).
    B2 = 200
    obs2 = jax.random.normal(jax.random.PRNGKey(1), (B2, num_obs), jnp.float32)
    v_tiled = jax.block_until_ready(
        mlp_critic_forward(obs2, params, compute_dtype=jnp.float32, tile_b=128))
    assert v_tiled.shape == (B2,), f"bad output shape {v_tiled.shape}"
    assert jnp.allclose(v_tiled, reference_forward(obs2, params), atol=1e-5, rtol=1e-5), \
        "tiled f32 mismatch vs. reference"

    print("KERNEL_OK")
</pallas_src>

<mosaic_0001>
module attributes {stable_mosaic.version = 11 : i64} {
  func.func @kernel(%arg0: i32, %arg1: memref<16x32xf32, #tpu.memory_space<vmem>>, %arg2: memref<32x64xf32, #tpu.memory_space<vmem>>, %arg3: memref<1x64xf32, #tpu.memory_space<vmem>>, %arg4: memref<64x64xf32, #tpu.memory_space<vmem>>, %arg5: memref<1x64xf32, #tpu.memory_space<vmem>>, %arg6: memref<8x64xf32, #tpu.memory_space<vmem>>, %arg7: memref<1xf32, #tpu.memory_space<smem>>, %arg8: memref<1x16xf32, #tpu.memory_space<vmem>>) attributes {dimension_semantics = [#tpu.dimension_semantics<parallel>], iteration_bounds = array<i64: 1>, scalar_prefetch = 0 : i64, scratch_operands = 0 : i64, tpu.core_type = #tpu.core_type<tc>, window_params = [{transform_indices = @transform_0, window_bounds = array<i64: 16, 32>}, {pipeline_mode = #tpu.pipeline_mode<synchronous>, transform_indices = @transform_1, window_bounds = array<i64: 32, 64>}, {pipeline_mode = #tpu.pipeline_mode<synchronous>, transform_indices = @transform_2, window_bounds = array<i64: 1, 64>}, {pipeline_mode = #tpu.pipeline_mode<synchronous>, transform_indices = @transform_3, window_bounds = array<i64: 64, 64>}, {pipeline_mode = #tpu.pipeline_mode<synchronous>, transform_indices = @transform_4, window_bounds = array<i64: 1, 64>}, {pipeline_mode = #tpu.pipeline_mode<synchronous>, transform_indices = @transform_5, window_bounds = array<i64: 8, 64>}, {transform_indices = @transform_6, window_bounds = array<i64: 1>}, {transform_indices = @transform_7, window_bounds = array<i64: 1, 16>}]} {
    %c0 = arith.constant 0 : index
    %c0_0 = arith.constant 0 : index
    %0 = vector.load %arg1[%c0, %c0_0] : memref<16x32xf32, #tpu.memory_space<vmem>>, vector<16x32xf32>
    %c0_1 = arith.constant 0 : index
    %c0_2 = arith.constant 0 : index
    %1 = vector.load %arg2[%c0_1, %c0_2] : memref<32x64xf32, #tpu.memory_space<vmem>>, vector<32x64xf32>
    %cst = arith.constant dense<0.000000e+00> : vector<16x64xf32>
    %2 = tpu.matmul %0, %1, %cst {dimension_numbers = #tpu.dot_dimension_numbers<[1], [0], [0], [1], [0, 0, 1, 1], [], []>} : vector<16x32xf32>, vector<32x64xf32>, vector<16x64xf32> -> vector<16x64xf32>
    %c0_3 = arith.constant 0 : index
    %c0_4 = arith.constant 0 : index
    %3 = vector.load %arg3[%c0_3, %c0_4] : memref<1x64xf32, #tpu.memory_space<vmem>>, vector<1x64xf32>
    %4 = vector.broadcast %3 : vector<1x64xf32> to vector<16x64xf32>
    %5 = arith.addf %2, %4 : vector<16x64xf32>
    %6 = math.tanh %5 : vector<16x64xf32>
    %c0_5 = arith.constant 0 : index
    %c0_6 = arith.constant 0 : index
    %7 = vector.load %arg4[%c0_5, %c0_6] : memref<64x64xf32, #tpu.memory_space<vmem>>, vector<64x64xf32>
    %cst_7 = arith.constant dense<0.000000e+00> : vector<16x64xf32>
    %8 = tpu.matmul %6, %7, %cst_7 {dimension_numbers = #tpu.dot_dimension_numbers<[1], [0], [0], [1], [0, 0, 1, 1], [], []>} : vector<16x64xf32>, vector<64x64xf32>, vector<16x64xf32> -> vector<16x64xf32>
    %c0_8 = arith.constant 0 : index
    %c0_9 = arith.constant 0 : index
    %9 = vector.load %arg5[%c0_8, %c0_9] : memref<1x64xf32, #tpu.memory_space<vmem>>, vector<1x64xf32>
    %10 = vector.broadcast %9 : vector<1x64xf32> to vector<16x64xf32>
    %11 = arith.addf %8, %10 : vector<16x64xf32>
    %12 = math.tanh %11 : vector<16x64xf32>
    %c0_10 = arith.constant 0 : index
    %c0_11 = arith.constant 0 : index
    %13 = vector.load %arg6[%c0_10, %c0_11] : memref<8x64xf32, #tpu.memory_space<vmem>>, vector<8x64xf32>
    %cst_12 = arith.constant dense<0.000000e+00> : vector<8x16xf32>
    %14 = tpu.matmul %13, %12, %cst_12 {dimension_numbers = #tpu.dot_dimension_numbers<[1], [1], [0], [0], [0, 0, 1, 0], [], []>} : vector<8x64xf32>, vector<16x64xf32>, vector<8x16xf32> -> vector<8x16xf32>
    %15 = vector.extract_strided_slice %14 {offsets = [0, 0], sizes = [1, 16], strides = [1, 1]} : vector<8x16xf32> to vector<1x16xf32>
    %c0_13 = arith.constant 0 : index
    %16 = memref.load %arg7[%c0_13] : memref<1xf32, #tpu.memory_space<smem>>
    %17 = vector.broadcast %16 : f32 to vector<1x16xf32>
    %18 = arith.addf %15, %17 : vector<1x16xf32>
    %c0_14 = arith.constant 0 : index
    %c0_15 = arith.constant 0 : index
    %19 = vector.load %arg8[%c0_14, %c0_15] : memref<1x16xf32, #tpu.memory_space<vmem>>, vector<1x16xf32>
    tpu.vector_store %arg8[%c0_14, %c0_15], %18 {strides = array<i32>} : memref<1x16xf32, #tpu.memory_space<vmem>>, vector<1x16xf32>,
    return
  }
  func.func @transform_0(%arg0: i32) -> (i32, i32) {
    %c0_i32 = arith.constant 0 : i32
    %c0_i32_0 = arith.constant 0 : i32
    return %arg0, %c0_i32 : i32, i32
  }
  func.func @transform_1(%arg0: i32) -> (i32, i32) {
    %c0_i32 = arith.constant 0 : i32
    %c0_i32_0 = arith.constant 0 : i32
    %c0_i32_1 = arith.constant 0 : i32
    return %c0_i32, %c0_i32_0 : i32, i32
  }
  func.func @transform_2(%arg0: i32) -> (i32, i32) {
    %c0_i32 = arith.constant 0 : i32
    %c0_i32_0 = arith.constant 0 : i32
    %c0_i32_1 = arith.constant 0 : i32
    return %c0_i32, %c0_i32_0 : i32, i32
  }
  func.func @transform_3(%arg0: i32) -> (i32, i32) {
    %c0_i32 = arith.constant 0 : i32
    %c0_i32_0 = arith.constant 0 : i32
    %c0_i32_1 = arith.constant 0 : i32
    return %c0_i32, %c0_i32_0 : i32, i32
  }
  func.func @transform_4(%arg0: i32) -> (i32, i32) {
    %c0_i32 = arith.constant 0 : i32
    %c0_i32_0 = arith.constant 0 : i32
    %c0_i32_1 = arith.constant 0 : i32
    return %c0_i32, %c0_i32_0 : i32, i32
  }
  func.func @transform_5(%arg0: i32) -> (i32, i32) {
    %c0_i32 = arith.constant 0 : i32
    %c0_i32_0 = arith.constant 0 : i32
    %c0_i32_1 = arith.constant 0 : i32
    return %c0_i32, %c0_i32_0 : i32, i32
  }
  func.func @transform_6(%arg0: i32) -> i32 {
    %c0_i32 = arith.constant 0 : i32
    %c0_i32_0 = arith.constant 0 : i32
    return %c0_i32 : i32
  }
  func.func @transform_7(%arg0: i32) -> (i32, i32) {
    %c0_i32 = arith.constant 0 : i32
    %c0_i32_0 = arith.constant 0 : i32
    return %c0_i32, %arg0 : i32, i32
  }
}

</mosaic_0001>

<bundles_post_ra>
// kernel: tpu_custom_call.1
= control target key start
LH: loop header
LB: loop body
LE: loop exit
PB: predicated region body
PF: predicated region fallthrough
CT: control target
= control target key end

     0   :  { %13 = vsyncpa [#allocation4], 0  ;;  %s700_s0 = inlined_call_operand.hbm [shape: f32[16,32], index: 0, kind: input, shape index: {}]   ;;  %s701_s1 = inlined_call_operand.hbm [shape: f32[32,64], index: 1, kind: input, shape index: {}]   ;;  %s702_s2 = inlined_call_operand.vmem [shape: f32[1,64], index: 2, kind: input, shape index: {}]   ;;  %s703_s3 = inlined_call_operand.hbm [shape: f32[64,64], index: 3, kind: input, shape index: {}]   ;;  %s704_s4 = inlined_call_operand.vmem [shape: f32[1,64], index: 4, kind: input, shape index: {}]   ;;  %s705_s5 = inlined_call_operand.vmem [shape: f32[8,64], index: 5, kind: input, shape index: {}]   ;;  %s706_s6 = inlined_call_operand.<no memory space> [shape: f32[1], index: 6, kind: input, shape index: {}]   ;;  %s707_s7 = inlined_call_operand.hbm [shape: f32[1,16], index: 7, kind: output, shape index: {}]  }
   0x1   :  { %14 = vsyncpa [#allocation7], 0 }
   0x2   :  { %15 = vsyncpa [#allocation5], 0  ;;  %s570_s24 = smov [#allocation6]   ;;  %s571_s26 = smov [#allocation3]  }
   0x3   :  { %s33_s25 = sshll.u32 %s570_s24, 4  ;;  %s21_s27 = sshll.u32 %s571_s26, 4  ;;  %s34_s25 = int_to_ptr.vmem [resolvable:$true] %s33_s25  ;;  %s619_s27 = int_to_ptr.vmem [resolvable:$true] %s21_s27 }
   0x4   :  { %s476_s30 = scalar_lea.hbm %s701_s1, 512 }
   0x5   :  { %p477_p0 = scmp.ne.s32.totalorder %s701_s1, %s476_s30  ;;  %p480_p1 = scmp.lt.u32.totalorder %s476_s30, %s701_s1 }
   0x7   :  { %p482_p2 = pnand %p480_p1, %p477_p0 }
   0x9   :  { %485 = shalt.err (!%p482_p2)
}
   0xa   :  { %s486_s12 = scalar_lea.vmem %s34_s25, 512  ;;  %p491_p4 = scmp.lt.s32.totalorder %s34_s25, %s34_s25 }
   0xb   :  { %p487_p3 = scmp.ne.s32.totalorder %s34_s25, %s486_s12  ;;  %p492_p5 = scmp.lt.s32.totalorder %s486_s12, %s486_s12 }
   0xd   :  { %p493_p6 = por %p492_p5, %p491_p4 }
   0xf   :  { %p494_p7 = pnand %p493_p6, %p487_p3 }
  0x11   :  { %497 = shalt.err (!%p494_p7)
}
  0x12   :  { %s572_s13 = smov 128   ;;  %s573_s14 = smov 8  }
  0x13   :  { %39 = dma.hbm_to_vmem [thread:$0]  %s701_s1, 512, %s34_s25, [#allocation7], %s572_s13, %s572_s13, %s573_s14  }
  0x14   :  { %s498_s19 = scalar_lea.hbm %s700_s0, 256 }
  0x15   :  { %p499_p8 = scmp.ne.s32.totalorder %s700_s0, %s498_s19  ;;  %p502_p9 = scmp.lt.u32.totalorder %s498_s19, %s700_s0 }
  0x17   :  { %p504_p10 = pnand %p502_p9, %p499_p8 }
  0x19   :  { %507 = shalt.err (!%p504_p10)
}
  0x1a   :  { %s508_s24 = scalar_lea.vmem %s619_s27, 256  ;;  %p513_p12 = scmp.lt.s32.totalorder %s619_s27, %s619_s27 }
  0x1b   :  { %p509_p11 = scmp.ne.s32.totalorder %s619_s27, %s508_s24  ;;  %p514_p13 = scmp.lt.s32.totalorder %s508_s24, %s508_s24 }
  0x1d   :  { %p515_p0 = por %p514_p13, %p513_p12 }
  0x1f   :  { %p516_p1 = pnand %p515_p0, %p509_p11 }
  0x21   :  { %519 = shalt.err (!%p516_p1)
}
  0x22   :  { %27 = dma.hbm_to_vmem [thread:$0]  %s700_s0, 256, %s619_s27, [#allocation4], %s572_s13, %s572_s13, %s573_s14  }
  0x23   :  { %s574_s26 = smov [#allocation8]   ;;  %s520_s8 = scalar_lea.hbm %s703_s3, 1024 }
  0x24   :  { %s47_s28 = sshll.u32 %s574_s26, 4  ;;  %p521_p2 = scmp.ne.s32.totalorder %s703_s3, %s520_s8  ;;  %s48_s28 = int_to_ptr.vmem [resolvable:$true] %s47_s28 }
  0x25   :  { %p524_p3 = scmp.lt.u32.totalorder %s520_s8, %s703_s3 }
  0x27   :  { %p526_p4 = pnand %p524_p3, %p521_p2 }
  0x29   :  { %529 = shalt.err (!%p526_p4)
}
  0x2a   :  { %s530_s15 = scalar_lea.vmem %s48_s28, 1024  ;;  %p535_p6 = scmp.lt.s32.totalorder %s48_s28, %s48_s28 }
  0x2b   :  { %p531_p5 = scmp.ne.s32.totalorder %s48_s28, %s530_s15  ;;  %p536_p7 = scmp.lt.s32.totalorder %s530_s15, %s530_s15 }
  0x2d   :  { %p537_p8 = por %p536_p7, %p535_p6 }
  0x2f   :  { %p538_p9 = pnand %p537_p8, %p531_p5 }
  0x31   :  { %541 = shalt.err (!%p538_p9)
}
  0x32   :  { %53 = dma.hbm_to_vmem [thread:$0]  %s703_s3, 1024, %s48_s28, [#allocation7], %s572_s13, %s572_s13, %s573_s14  }
  0x33   :  { %564 = dma.done.wait [#allocation4], 256  }
  0x34   :  { %565 = vsyncadd [#allocation4], 4294967040 }
  0x35   :  { %566 = dma.done.wait [#allocation7], 1536  }
  0x36   :  { %567 = vsyncadd [#allocation7], 4294965760  ;;  %vm82_vm0 = vcmask 261120   ;;  %v71_v0 = vld [vmem:[#allocation6] sm:$0xff]  ;;  %v72_v1 = vld [vmem:[#allocation6 + $0x8] sm:$0xff]  ;;  %vm181_vm1 = vcmask 523264   ;;  %v346_v38 = vstv %s706_s6 }
  0x37   :  { %v73_v2 = vld [vmem:[#allocation6 + $0x10] sm:$0xff]  ;;  %v431_v3 = vpack.c.bf16 %v72_v1, %v71_v0  ;;  %v74_v4 = vld [vmem:[#allocation6 + $0x18] sm:$0xff]  ;;  %v166_v8 = vld [vmem:[#allocation8] sm:$0xff]  ;;  %v575_v27 = vmov 0.0|0.0   ;;  %vm576_vm2 = vmmov 0   ;;  %v577_v28 = vmov 0.0  }
  0x38   :  { %v69_v5 = vld [vmem:[#allocation3] sm:$0xff]  ;;  %v435_v6 = vpack.c.bf16 %v74_v4, %v73_v2  ;;  %v70_v7 = vld [vmem:[#allocation3 + $0x8] sm:$0xff]  ;;  %v167_v9 = vld [vmem:[#allocation8 + $0x8] sm:$0xff]  ;;  %s578_s19 = smov [#allocation9]   ;;  %vm348_vm4 = vcmask 122880  }
  0x39   :  { %402 = vmatprep.mubr.msk.f32.mxu0 %vm82_vm0, %v69_v5  ;;  %432 = vmatprep.subr.bf16.mxu0 %v431_v3  ;;  %v439_v10 = vpack.c.bf16 %v167_v9, %v166_v8  ;;  %v168_v11 = vld [vmem:[#allocation8 + $0x10] sm:$0xff]  ;;  %v169_v12 = vld [vmem:[#allocation8 + $0x18] sm:$0xff]  ;;  %v170_v14 = vld [vmem:[#allocation8 + $0x20] sm:$0xff]  ;;  %s356_s20 = sshll.u32 %s578_s19, 4  ;;  %s357_s20 = int_to_ptr.vmem [resolvable:$true] %s356_s20 }
  0x3a   :  { %434 = vmatpush3.bf16.msra.mxu0 %v431_v3  ;;  %v443_v13 = vpack.c.bf16 %v169_v12, %v168_v11  ;;  %v171_v15 = vld [vmem:[#allocation8 + $0x28] sm:$0xff]  ;;  %v172_v16 = vld [vmem:[#allocation8 + $0x30] sm:$0xff]  ;;  %v173_v18 = vld [vmem:[#allocation8 + $0x38] sm:$0xff]  ;;  %s542_s21 = scalar_lea.vmem %s357_s20, 16  ;;  %s546_s22 = scalar_lea.vmem %s357_s20, 32 }
  0x3b   :  { %436 = vmatprep.subr.bf16.mxu0 %v435_v6  ;;  %440 = vmatprep.subr.bf16.mxu1 %v439_v10  ;;  %v447_v17 = vpack.c.bf16 %v171_v15, %v170_v14  ;;  %v451_v19 = vpack.c.bf16 %v173_v18, %v172_v16  ;;  %v366_v20 = vld [vmem:[%s702_s2] ss:$0 sm:$0xff]  ;;  %vm457_vm3 = vmpackc.low %vm181_vm1, %vm181_vm1  ;;  %p543_p10 = scmp.ne.s32.totalorder %s357_s20, %s542_s21  ;;  %p547_p11 = scmp.lt.s32.totalorder %s357_s20, %s357_s20 }
  0x3c   :  { %442 = vmatpush3.bf16.msra.mxu1 %v439_v10  ;;  %v369_v29 = vld [vmem:[%s704_s4] ss:$0 sm:$0xff]  ;;  %p548_p12 = scmp.lt.s32.totalorder %s546_s22, %s542_s21 }
  0x3d   :  { %444 = vmatprep.subr.bf16.mxu1 %v443_v13  ;;  %v265_v37 = vld [vmem:[%s705_s5] sm:$0xff] }
  0x3e   :  { %438 = vmatpush3.bf16.msra.mxu0 %v435_v6  ;;  %p549_p13 = por %p548_p12, %p547_p11 }
  0x3f   :  { %455 = vmatprep.subr.bf16.mxu0 %v575_v27 }
  0x40   :  { %446 = vmatpush3.bf16.msra.mxu1 %v443_v13  ;;  %p550_p0 = pnand %p549_p13, %p543_p10 }
  0x41   :  { %403 = vmatmul.mubr.msk.f32.vlgmr.msra.gmra.mrb[0].mxu0 %vm82_vm0, %v70_v7  ;;  %448 = vmatprep.subr.bf16.mxu1 %v447_v17 }
  0x42   :  { %428 = vmatprep.mubr.msk.f32.mxu0 %vm576_vm2, %v577_v28 }
  0x44   :  { %450 = vmatpush3.bf16.msra.mxu1 %v447_v17 }
  0x45   :  { %452 = vmatprep.subr.bf16.mxu1 %v451_v19 }
  0x48   :  { %454 = vmatpush3.bf16.msra.mxu1 %v451_v19 }
 0x114   :  { %v404_v21 = vpop.f32.mrb[0].mxu0 }
 0x115   :  { %v161_v22 = vadd.f32 %v404_v21, %v366_v20  ;;  %v155_v23 = vpop.f32.mrb[1].mxu0 }
 0x116   :  { %v156_v24 = vadd.f32 %v366_v20, %v155_v23 }
 0x118   :  { %468 = vtanh.f32 %v156_v24 }
 0x119   :  { %470 = vtanh.f32 %v161_v22 }
 0x122   :  { %v469_v25 = vpop.eup %468 }
 0x123   :  { %v471_v26 = vpop.eup %470  ;;  %421 = vmatprep.mubr.msk.f32.mxu1 %vm181_vm1, %v469_v25 }
 0x124   :  { %422 = vmatmul.mubr.msk.f32.vlgmr.msra.gmra.mrb[0].mxu1 %vm181_vm1, %v471_v26 }
 0x1f7   :  { %v423_v30 = vpop.f32.mrb[0].mxu1 }
 0x1f8   :  { %v260_v31 = vadd.f32 %v423_v30, %v369_v29  ;;  %v254_v32 = vpop.f32.mrb[1].mxu1 }
 0x1f9   :  { %v255_v33 = vadd.f32 %v369_v29, %v254_v32 }
 0x1fa   :  { %472 = vtanh.f32 %v260_v31 }
 0x1fb   :  { %474 = vtanh.f32 %v255_v33 }
 0x204   :  { %v473_v34 = vpop.eup %472 }
 0x205   :  { %v475_v35 = vpop.eup %474 }
 0x206   :  { %v456_v36 = vpack.c.bf16 %v473_v34, %v475_v35 }
 0x208   :  { %458 = vmatpush3.bf16.xpose.msk.msra.mxu0 %vm457_vm3, %v456_v36 }
 0x20f   :  { %429 = vmatmul.mubr.msk.f32.vlgmr.msra.gmra.mrb[2].mxu0 %vm181_vm1, %v265_v37 }
 0x2e2   :  { %v341_v39 = vpop.f32.mrb[2].mxu0 }
 0x2e3   :  { %v347_v40 = vadd.f32 %v346_v38, %v341_v39  ;;  %v430_v41 = vpop.f32.mrb[3].mxu0 }
 0x2e5   :  { %349 = vst.msk [vmem:[#allocation9] sm:$0x1] %vm348_vm4, %v347_v40 }
 0x2e6   :  { %553 = shalt.err (!%p550_p0)
}
 0x2e7   :  { %s554_s6 = scalar_lea.hbm %s707_s7, 16 }
 0x2e8   :  { %p555_p1 = scmp.ne.s32.totalorder %s707_s7, %s554_s6  ;;  %p558_p2 = scmp.lt.u32.totalorder %s554_s6, %s707_s7 }
 0x2ea   :  { %p560_p3 = pnand %p558_p2, %p555_p1 }
 0x2ec   :  { %563 = shalt.err (!%p560_p3)
}
 0x2ed   :  { %359 = dma.vmem_to_hbm [thread:$0]  %s357_s20, 16, %s707_s7, [#allocation5]  }
 0x2ee   :  { %568 = dma.done.wait [#allocation5], 16  }
 0x2ef   :  { %569 = vsyncadd [#allocation5], 4294967280 }
 0x2f0   :  { %363 = vsyncpa [#allocation4], 1 }
 0x2f1   :  { %364 = vsyncpa [#allocation7], 1 }
 0x2f2   :  { %365 = vsyncpa [#allocation5], 1 }

</bundles_post_ra>
